<compile_context>
chip_gen: v5e
topology: v5e:2x2
jax: 0.10.0
libtpu: 0.0.40
codegen_flags: <defaults>
</compile_context>

<pallas_src>
import numpy as np
import jax
import jax.numpy as jnp
from jax import lax
from jax.experimental import pallas as pl
from jax.experimental.pallas import tpu as pltpu


def _round_up(x, k):
    return ((x + k - 1) // k) * k


def _embedding_bag_mxu_kernel(idx_ref, w_ref, out_ref):
    """One grid step = one tile of TB bags (counts @ weight on the MXU).

    idx_ref : (TB, L) int32 VMEM block; per-bag index slots, padded with -1.
    w_ref   : (n_pad, m_pad) embedding table, resident (unblocked) in VMEM.
    out_ref : (TB, m_pad) output tile.
    """
    tb, num_slots = idx_ref.shape
    n_pad = w_ref.shape[0]

    idx = idx_ref[...]                                            # (TB, L) int32
    # Row-id grid, hoisted out of the slot loop (JAX does not CSE broadcasts).
    row_ids = lax.broadcasted_iota(jnp.int32, (tb, n_pad), 1)     # (TB, n_pad)

    # counts[b, r] = multiplicity of table row r in bag b.  Each slot j handles
    # one index of every bag with a single full-vreg (TB, n_pad) compare+select
    # +add on the VPU; sentinel -1 slots never match and contribute zero.  The
    # loop is fully static (uniform padded bag length).
    counts = jnp.zeros((tb, n_pad), jnp.float32)
    for j in range(num_slots):
        hit = idx[:, j:j + 1] == row_ids
        counts = counts + jnp.where(hit, jnp.float32(1.0), jnp.float32(0.0))

    # One MXU matmul per bag tile replaces the per-index row-gather+add chain.
    # Counts are small integers, exactly representable in bf16/f32.
    w = w_ref[...]
    out = jnp.dot(counts.astype(w.dtype), w, preferred_element_type=jnp.float32)
    out_ref[...] = out.astype(out_ref.dtype)


def _choose_bags_per_tile(num_bags, target):
    # Large tiles amortize the ~0.35us/grid-step overhead and give dense output
    # stores, but keep >= 2 tiles when there are enough bags so both v7x
    # TensorCores get work.  Tile height rounded to a sublane multiple.
    tb = min(int(target), max(8, -(-num_bags // 2)))
    return _round_up(tb, 8)


def habana_embedding_bag_forward(weight, indices_fwd, offsets, valid_count_fwd,
                                 *, bags_per_tile=128, max_bag_len=None,
                                 table_dtype=None):
    """Forward of HabanaEmbeddingBag (EmbeddingBag, mode='sum').

    Out-of-range indices and padding past valid_count_fwd contribute zero
    (PyTorch would raise on out-of-range indices; here they are dropped).
    Pass `max_bag_len` (a static upper bound on bag length) to avoid one
    data-dependent host sync.  `table_dtype=jnp.bfloat16` halves the VMEM
    residency of the table on v6e/v7x (accumulation stays f32).
    """
    n, m = weight.shape
    num_bags = int(offsets.shape[0])
    out_dtype = weight.dtype
    tbl_dtype = jnp.dtype(table_dtype) if table_dtype is not None else jnp.dtype(out_dtype)

    indices = jnp.asarray(indices_fwd, jnp.int32).reshape(-1)
    offsets = jnp.asarray(offsets, jnp.int32).reshape(-1)
    vc = jnp.asarray(valid_count_fwd, jnp.int32).reshape(-1)[0]
    vc = jnp.minimum(vc, jnp.int32(indices.shape[0]))

    # Per-bag [start, end): end[b] = offsets[b+1]; last bag ends at valid_count.
    starts = jnp.minimum(offsets, vc)
    ends = jnp.minimum(jnp.concatenate([offsets[1:], vc[None]]), vc)
    ends = jnp.maximum(ends, starts)

    # Uniform per-bag slot count (static).  If not supplied, derive it from the
    # data (one host sync).
    if max_bag_len is None:
        max_bag_len = int(jax.device_get(jnp.max(ends - starts)))
    num_slots = max(8, _round_up(max(int(max_bag_len), 1), 8))

    # Bag tiling.
    tb = _choose_bags_per_tile(num_bags, bags_per_tile)
    num_tiles = pl.cdiv(num_bags, tb)
    padded_bags = num_tiles * tb

    # Dense (bags, L) index matrix; sentinel -1 in padded / out-of-range slots
    # so they contribute exactly zero (no clamp-to-row-0/row-(n-1) artifacts).
    positions = starts[:, None] + jnp.arange(num_slots, dtype=jnp.int32)[None, :]
    valid = positions < ends[:, None]
    gathered = jnp.take(indices, jnp.where(valid, positions, 0), axis=0)
    keep = valid & (gathered >= 0) & (gathered < n)
    idx_mat = jnp.where(keep, gathered, jnp.int32(-1))
    if padded_bags > num_bags:
        idx_mat = jnp.pad(idx_mat, ((0, padded_bags - num_bags), (0, 0)),
                          constant_values=-1)

    # Pad the table: contraction dim (rows) to a multiple of 128 (256 once it
    # is >= 256, for the 2x256x256 MXU on v6e/v7x), embedding dim to a multiple
    # of 128 so output stores are unmasked full-lane vst.  Padded rows are zero
    # and are never addressed (sentinel never matches them anyway).
    n_pad = _round_up(n, 128)
    if n_pad >= 256:
        n_pad = _round_up(n_pad, 256)
    m_pad = _round_up(m, 128)
    w = weight.astype(tbl_dtype)
    if (n_pad, m_pad) != (n, m):
        w = jnp.pad(w, ((0, n_pad - n), (0, m_pad - m)))

    # VMEM budget (generation aware).  The resident unblocked table is
    # single-buffered; only the per-tile index and output blocks are
    # double-buffered by the pipeline.
    try:
        vmem_cap = int(pltpu.get_tpu_info().vmem_capacity_bytes)
    except Exception:
        vmem_cap = 64 << 20  # conservative: v7x per-TensorCore VMEM
    w_bytes = n_pad * m_pad * tbl_dtype.itemsize
    if w_bytes > (3 * vmem_cap) // 4:
        # TODO(synk): streaming path for tables that do not fit VMEM
        # (weight in memory_space=pl.ANY + manual DMA slab gather, or a
        # K-blocked counts@weight) — needed for recommender-scale tables,
        # especially on v7x's 64 MiB per-TensorCore VMEM.
        raise NotImplementedError(
            f"embedding table ({w_bytes} bytes) exceeds the resident-VMEM path "
            f"budget (capacity {vmem_cap} bytes); streaming path not implemented")
    needed = (w_bytes
              + 2 * tb * num_slots * 4                              # idx blocks
              + 2 * tb * m_pad * jnp.dtype(out_dtype).itemsize      # out blocks
              + tb * n_pad * 4                                      # counts working set
              + (4 << 20))                                          # compiler headroom
    vmem_limit = int(min(max(needed, 16 << 20), (9 * vmem_cap) // 10))

    grid_spec = pltpu.PrefetchScalarGridSpec(
        num_scalar_prefetch=0,
        grid=(num_tiles,),
        in_specs=[
            # Per-tile slice of the dense index matrix (auto-pipelined VMEM
            # block) — the full index stream never touches SMEM.
            pl.BlockSpec((tb, num_slots), lambda t: (t, 0)),
            # Whole padded table resident in VMEM once (single-buffered).
            pl.BlockSpec(memory_space=pltpu.MemorySpace.VMEM),
        ],
        out_specs=pl.BlockSpec((tb, m_pad), lambda t: (t, 0)),
    )

    out = pl.pallas_call(
        _embedding_bag_mxu_kernel,
        out_shape=jax.ShapeDtypeStruct((padded_bags, m_pad), out_dtype),
        grid_spec=grid_spec,
        compiler_params=pltpu.CompilerParams(
            dimension_semantics=("parallel",),   # bag tiles are independent
            vmem_limit_bytes=vmem_limit),
    )(idx_mat, w)

    return out[:num_bags, :m]


if __name__ == "__main__":
    key = jax.random.PRNGKey(0)
    kw, ki, kl = jax.random.split(key, 3)

    # Module __init__ shapes: weight is (n, m) = (num_embeddings, embedding_dim).
    n, m = 64, 128
    num_bags = 16            # small batch of bags (gives 2 grid tiles)

    weight = jax.random.normal(kw, (n, m), dtype=jnp.float32) * 0.05

    # Bag lengths in [1, 4]; offsets = exclusive prefix sum of lengths.
    lens = jax.random.randint(kl, (num_bags,), 1, 5).astype(jnp.int32)
    offsets = jnp.concatenate(
        [jnp.zeros((1,), jnp.int32), jnp.cumsum(lens)[:-1].astype(jnp.int32)])
    total = int(np.asarray(jnp.sum(lens)))

    # Flat indices, padded past valid_count (padding must be ignored).
    indices_valid = jax.random.randint(ki, (total,), 0, n).astype(jnp.int32)
    pad = 8
    indices_fwd = jnp.concatenate([indices_valid, jnp.zeros((pad,), jnp.int32)])
    valid_count_fwd = jnp.array([total], dtype=jnp.int32)

    out = habana_embedding_bag_forward(weight, indices_fwd, offsets,
                                       valid_count_fwd)
    out = jax.block_until_ready(out)

    # Pure-numpy reference for correctness.
    w_np = np.asarray(weight)
    idx_np = np.asarray(indices_valid)
    off_np = np.asarray(offsets)
    len_np = np.asarray(lens)
    ref = np.stack([
        w_np[idx_np[off_np[b]:off_np[b] + len_np[b]]].sum(axis=0)
        for b in range(num_bags)
    ])
    np.testing.assert_allclose(np.asarray(out), ref, rtol=1e-5, atol=1e-5)

    print("KERNEL_OK")
</pallas_src>

<mosaic_0001>
module attributes {stable_mosaic.version = 11 : i64} {
  func.func @_embedding_bag_mxu_kernel(%arg0: i32, %arg1: memref<8x8xi32, #tpu.memory_space<vmem>>, %arg2: memref<128x128xf32, #tpu.memory_space<vmem>>, %arg3: memref<8x128xf32, #tpu.memory_space<vmem>>) attributes {dimension_semantics = [#tpu.dimension_semantics<parallel>], iteration_bounds = array<i64: 2>, scalar_prefetch = 0 : i64, scratch_operands = 0 : i64, tpu.core_type = #tpu.core_type<tc>, window_params = [{transform_indices = @transform_0, window_bounds = array<i64: 8, 8>}, {pipeline_mode = #tpu.pipeline_mode<synchronous>, transform_indices = @transform_1, window_bounds = array<i64: 128, 128>}, {transform_indices = @transform_2, window_bounds = array<i64: 8, 128>}]} {
    %c0 = arith.constant 0 : index
    %c0_0 = arith.constant 0 : index
    %0 = vector.load %arg1[%c0, %c0_0] : memref<8x8xi32, #tpu.memory_space<vmem>>, vector<8x8xi32>
    %1 = tpu.iota {dimensions = array<i32: 1>} : vector<8x128xi32>
    %cst = arith.constant 0.000000e+00 : f32
    %2 = vector.broadcast %cst : f32 to vector<8x128xf32>
    %3 = vector.extract_strided_slice %0 {offsets = [0, 0], sizes = [8, 1], strides = [1, 1]} : vector<8x8xi32> to vector<8x1xi32>
    %4 = vector.broadcast %3 : vector<8x1xi32> to vector<8x128xi32>
    %5 = arith.cmpi eq, %4, %1 : vector<8x128xi32>
    %cst_1 = arith.constant 1.000000e+00 : f32
    %cst_2 = arith.constant 0.000000e+00 : f32
    %6 = vector.broadcast %cst_1 : f32 to vector<8x128xf32>
    %7 = vector.broadcast %cst_2 : f32 to vector<8x128xf32>
    %8 = arith.select %5, %6, %7 : vector<8x128xi1>, vector<8x128xf32>
    %9 = arith.addf %2, %8 : vector<8x128xf32>
    %10 = vector.extract_strided_slice %0 {offsets = [0, 1], sizes = [8, 1], strides = [1, 1]} : vector<8x8xi32> to vector<8x1xi32>
    %11 = vector.broadcast %10 : vector<8x1xi32> to vector<8x128xi32>
    %12 = arith.cmpi eq, %11, %1 : vector<8x128xi32>
    %cst_3 = arith.constant 1.000000e+00 : f32
    %cst_4 = arith.constant 0.000000e+00 : f32
    %13 = vector.broadcast %cst_3 : f32 to vector<8x128xf32>
    %14 = vector.broadcast %cst_4 : f32 to vector<8x128xf32>
    %15 = arith.select %12, %13, %14 : vector<8x128xi1>, vector<8x128xf32>
    %16 = arith.addf %9, %15 : vector<8x128xf32>
    %17 = vector.extract_strided_slice %0 {offsets = [0, 2], sizes = [8, 1], strides = [1, 1]} : vector<8x8xi32> to vector<8x1xi32>
    %18 = vector.broadcast %17 : vector<8x1xi32> to vector<8x128xi32>
    %19 = arith.cmpi eq, %18, %1 : vector<8x128xi32>
    %cst_5 = arith.constant 1.000000e+00 : f32
    %cst_6 = arith.constant 0.000000e+00 : f32
    %20 = vector.broadcast %cst_5 : f32 to vector<8x128xf32>
    %21 = vector.broadcast %cst_6 : f32 to vector<8x128xf32>
    %22 = arith.select %19, %20, %21 : vector<8x128xi1>, vector<8x128xf32>
    %23 = arith.addf %16, %22 : vector<8x128xf32>
    %24 = vector.extract_strided_slice %0 {offsets = [0, 3], sizes = [8, 1], strides = [1, 1]} : vector<8x8xi32> to vector<8x1xi32>
    %25 = vector.broadcast %24 : vector<8x1xi32> to vector<8x128xi32>
    %26 = arith.cmpi eq, %25, %1 : vector<8x128xi32>
    %cst_7 = arith.constant 1.000000e+00 : f32
    %cst_8 = arith.constant 0.000000e+00 : f32
    %27 = vector.broadcast %cst_7 : f32 to vector<8x128xf32>
    %28 = vector.broadcast %cst_8 : f32 to vector<8x128xf32>
    %29 = arith.select %26, %27, %28 : vector<8x128xi1>, vector<8x128xf32>
    %30 = arith.addf %23, %29 : vector<8x128xf32>
    %31 = vector.extract_strided_slice %0 {offsets = [0, 4], sizes = [8, 1], strides = [1, 1]} : vector<8x8xi32> to vector<8x1xi32>
    %32 = vector.broadcast %31 : vector<8x1xi32> to vector<8x128xi32>
    %33 = arith.cmpi eq, %32, %1 : vector<8x128xi32>
    %cst_9 = arith.constant 1.000000e+00 : f32
    %cst_10 = arith.constant 0.000000e+00 : f32
    %34 = vector.broadcast %cst_9 : f32 to vector<8x128xf32>
    %35 = vector.broadcast %cst_10 : f32 to vector<8x128xf32>
    %36 = arith.select %33, %34, %35 : vector<8x128xi1>, vector<8x128xf32>
    %37 = arith.addf %30, %36 : vector<8x128xf32>
    %38 = vector.extract_strided_slice %0 {offsets = [0, 5], sizes = [8, 1], strides = [1, 1]} : vector<8x8xi32> to vector<8x1xi32>
    %39 = vector.broadcast %38 : vector<8x1xi32> to vector<8x128xi32>
    %40 = arith.cmpi eq, %39, %1 : vector<8x128xi32>
    %cst_11 = arith.constant 1.000000e+00 : f32
    %cst_12 = arith.constant 0.000000e+00 : f32
    %41 = vector.broadcast %cst_11 : f32 to vector<8x128xf32>
    %42 = vector.broadcast %cst_12 : f32 to vector<8x128xf32>
    %43 = arith.select %40, %41, %42 : vector<8x128xi1>, vector<8x128xf32>
    %44 = arith.addf %37, %43 : vector<8x128xf32>
    %45 = vector.extract_strided_slice %0 {offsets = [0, 6], sizes = [8, 1], strides = [1, 1]} : vector<8x8xi32> to vector<8x1xi32>
    %46 = vector.broadcast %45 : vector<8x1xi32> to vector<8x128xi32>
    %47 = arith.cmpi eq, %46, %1 : vector<8x128xi32>
    %cst_13 = arith.constant 1.000000e+00 : f32
    %cst_14 = arith.constant 0.000000e+00 : f32
    %48 = vector.broadcast %cst_13 : f32 to vector<8x128xf32>
    %49 = vector.broadcast %cst_14 : f32 to vector<8x128xf32>
    %50 = arith.select %47, %48, %49 : vector<8x128xi1>, vector<8x128xf32>
    %51 = arith.addf %44, %50 : vector<8x128xf32>
    %52 = vector.extract_strided_slice %0 {offsets = [0, 7], sizes = [8, 1], strides = [1, 1]} : vector<8x8xi32> to vector<8x1xi32>
    %53 = vector.broadcast %52 : vector<8x1xi32> to vector<8x128xi32>
    %54 = arith.cmpi eq, %53, %1 : vector<8x128xi32>
    %cst_15 = arith.constant 1.000000e+00 : f32
    %cst_16 = arith.constant 0.000000e+00 : f32
    %55 = vector.broadcast %cst_15 : f32 to vector<8x128xf32>
    %56 = vector.broadcast %cst_16 : f32 to vector<8x128xf32>
    %57 = arith.select %54, %55, %56 : vector<8x128xi1>, vector<8x128xf32>
    %58 = arith.addf %51, %57 : vector<8x128xf32>
    %c0_17 = arith.constant 0 : index
    %c0_18 = arith.constant 0 : index
    %59 = vector.load %arg2[%c0_17, %c0_18] : memref<128x128xf32, #tpu.memory_space<vmem>>, vector<128x128xf32>
    %cst_19 = arith.constant dense<0.000000e+00> : vector<8x128xf32>
    %60 = tpu.matmul %58, %59, %cst_19 {dimension_numbers = #tpu.dot_dimension_numbers<[1], [0], [0], [1], [0, 0, 1, 1], [], []>} : vector<8x128xf32>, vector<128x128xf32>, vector<8x128xf32> -> vector<8x128xf32>
    %c0_20 = arith.constant 0 : index
    %c0_21 = arith.constant 0 : index
    %61 = vector.load %arg3[%c0_20, %c0_21] : memref<8x128xf32, #tpu.memory_space<vmem>>, vector<8x128xf32>
    tpu.vector_store %arg3[%c0_20, %c0_21], %60 {strides = array<i32>} : memref<8x128xf32, #tpu.memory_space<vmem>>, vector<8x128xf32>,
    return
  }
  func.func @transform_0(%arg0: i32) -> (i32, i32) {
    %c0_i32 = arith.constant 0 : i32
    %c0_i32_0 = arith.constant 0 : i32
    return %arg0, %c0_i32 : i32, i32
  }
  func.func @transform_1(%arg0: i32) -> (i32, i32) {
    %c0_i32 = arith.constant 0 : i32
    %c0_i32_0 = arith.constant 0 : i32
    %c0_i32_1 = arith.constant 0 : i32
    return %c0_i32, %c0_i32_0 : i32, i32
  }
  func.func @transform_2(%arg0: i32) -> (i32, i32) {
    %c0_i32 = arith.constant 0 : i32
    %c0_i32_0 = arith.constant 0 : i32
    return %arg0, %c0_i32 : i32, i32
  }
}

</mosaic_0001>

<bundles_post_ra>
// kernel: tpu_custom_call.1
= control target key start
LH: loop header
LB: loop body
LE: loop exit
PB: predicated region body
PF: predicated region fallthrough
CT: control target
= control target key end

     0   :  { %7 = vsyncpa [#allocation3], 0  ;;  %s633_s0 = inlined_call_operand.vmem [shape: s32[16,8], index: 0, kind: input, shape index: {}]   ;;  %s634_s1 = inlined_call_operand.hbm [shape: f32[128,128], index: 1, kind: input, shape index: {}]   ;;  %s635_s2 = inlined_call_operand.hbm [shape: f32[16,128], index: 2, kind: output, shape index: {}]  }
   0x1   :  { %8 = vsyncpa [#allocation4], 0 }
   0x2   :  { %10 = vsyncpa [#allocation4 + $0x1], 0  ;;  %s538_s9 = smov 0   ;;  %s540_s10 = smov 0  }
   0x3   :  { %s542_s11 = smov 0   ;;  %s544_s12 = smov 0  }
   0x4 LB: > { %s559_s13 = sadd.s32 4294967295, %s509_s12   ;;  %s331_s14 = sadd.s32 4294967294, %s509_s12   ;;  %s509_s12 = sphi %s544_s12, %s641_s12   ;;  %s505_s11 = sphi %s542_s11, %s640_s11   ;;  %s501_s10 = sphi %s540_s10, %s639_s10   ;;  %s497_s9 = sphi %s538_s9, %s638_s9  }
   0x5   : > { %s563_s15 = sadd.s32 1, %s509_s12   ;;  %s70_s16 = sadd.s32 1, %s505_s11 }
   0x6   : > { %s67_s17 = ssub.s32 %s509_s12, %s563_s15  ;;  %p80_p0 = scmp.ne.s32.totalorder %s505_s11, %s501_s10 }
   0x7   : > { %p68_p1 = scmp.eq.s32.totalorder %s67_s17, 0  ;;  %p81_p2 = scmp.eq.s32.totalorder %s559_s13, 1 }
   0x8   : > { %p86_p3 = scmp.ne.s32.totalorder %s501_s10, %s497_s9  ;;  %p87_p4 = scmp.eq.s32.totalorder %s331_s14, 1 }
   0x9   : > { %s574_s18 = scalar_select %p68_p1, %s505_s11, %s70_s16  }
   0xa   : > { %p576_p5 = por %p81_p2, %p80_p0  ;;  %p580_p6 = por %p87_p4, %p86_p3 }
   0xb   : > { %p332_p7 = scmp.ge.s32.totalorder %s509_s12, 1  ;;  %p94_p8 = scmp.lt.s32.totalorder %s509_s12, 3 }
   0xc   : > { %p357_p9 = scmp.eq.s32.totalorder %s559_s13, 0  ;;  %s105_s23 = sshll.u32 %s634_s1, 4  ;;  %s106_s23 = int_to_ptr.hbm [resolvable:$true] %s105_s23 }
   0xd   : > { %p95_p10 = pnand %p332_p7, %p94_p8  ;;  %s511_s24 = smov [#allocation2]  }
   0xe   : > { %s107_s25 = sshll.u32 %s511_s24, 4  ;;  %s512_s26 = smov 128   ;;  %s108_s25 = int_to_ptr.vmem [resolvable:$true] %s107_s25 }
   0xf   : > { %p349_p11 = pneg %p95_p10  ;;  %s513_s27 = smov 8  }
  0x10   : > { %130 = sbr.rel (%p95_p10) target bundleno = 298 (0x12a), region = 28 }
  0x11   : > { %p350_p12 = pnand %p357_p9, %p349_p11 }
  0x13   : > { %352 = dma.hbm_to_vmem [thread:$0]  (!%p350_p12), %s106_s23, 2048, %s108_s25, [#allocation3], %s512_s26, %s512_s26, %s513_s27  }
  0x15   : > { %488 = dma.done.wait (%p357_p9), [#allocation3], 2048  }
  0x16   : > { %490 = vsyncadd (%p357_p9), [#allocation3], 4294965248  ;;  %p152_p13 = scmp.lt.s32.totalorder %s559_s13, 1  ;;  %v514_v0 = vmov 0   ;;  %v515_v1 = vmov 2   ;;  %v516_v2 = vmov 4   ;;  %v157_v26 = vlaneseq }
  0x17   : > { %404 = vset.pattern.permute.xlu0 %v514_v0  ;;  %406 = vset.pattern.permute.xlu1 %v515_v1  ;;  %v222_v4 = vld [vmem:[#allocation2 + $0x78] sm:$0xff]  ;;  %v221_v5 = vld [vmem:[#allocation2 + $0x70] sm:$0xff]  ;;  %v220_v6 = vld [vmem:[#allocation2 + $0x68] sm:$0xff]  ;;  %v517_v7 = vmov 1   ;;  %v518_v8 = vmov 3   ;;  %v519_v9 = vmov 5  }
  0x18   : > { %s153_s28 = scalar_select %p152_p13, %s559_s13, 1  ;;  %408 = vset.pattern.permute.xlu2 %v516_v2  ;;  %223 = vmatpush.msra.mxu0 %v222_v4  ;;  %v520_v10 = vmov 6   ;;  %v521_v11 = vmov 7   ;;  %v219_v12 = vld [vmem:[#allocation2 + $0x60] sm:$0xff]  ;;  %v218_v13 = vld [vmem:[#allocation2 + $0x58] sm:$0xff]  ;;  %v217_v14 = vld [vmem:[#allocation2 + $0x50] sm:$0xff] }
  0x19   : > { %v216_v15 = vld [vmem:[#allocation2 + $0x48] sm:$0xff]  ;;  %v215_v16 = vld [vmem:[#allocation2 + $0x40] sm:$0xff]  ;;  %v214_v17 = vld [vmem:[#allocation2 + $0x38] sm:$0xff]  ;;  %v158_v29 = vand.u32 127, %v157_v26  ;;  %v522_v33 = vmov 0.0   ;;  %s149_s5 = sand.u32 1, %s501_s10  }
  0x1a   : > { %s338_s29 = sshll.u32 %s153_s28, 3  ;;  %224 = vmatpush.msra.mxu0 %v221_v5  ;;  %v213_v18 = vld [vmem:[#allocation2 + $0x30] sm:$0xff]  ;;  %v212_v19 = vld [vmem:[#allocation2 + $0x28] sm:$0xff]  ;;  %v211_v20 = vld [vmem:[#allocation2 + $0x20] sm:$0xff]  ;;  %s337_s6 = sshll.u32 %s149_s5, 3 }
  0x1b   : > { %s155_s4 = scalar_lea.vmem %s633_s0, %s338_s29  ;;  %v210_v21 = vld [vmem:[#allocation2 + $0x18] sm:$0xff]  ;;  %v209_v22 = vld [vmem:[#allocation2 + $0x10] sm:$0xff]  ;;  %v208_v23 = vld [vmem:[#allocation2 + $0x8] sm:$0xff]  ;;  %s340_s7 = sshll.u32 %s559_s13, 3 }
  0x1c   : > { %v156_v3 = vld [vmem:[%s155_s4] sm:$0xff]  ;;  %225 = vmatpush.msra.mxu0 %v220_v6  ;;  %s255_s16 = scalar_lea.hbm %s635_s2, %s340_s7  ;;  %s151_s17 = scalar_lea.vmem [#allocation5], %s337_s6 }
  0x1d   : > { %160 = vperm.xlu0 %404, %v156_v3   ;;  %172 = vperm.xlu1 %406, %v156_v3   ;;  %v207_v24 = vld [vmem:[#allocation2] sm:$0xff]  ;;  %s257_s21 = sshll.u32 %s151_s17, 4  ;;  %s259_s22 = sshll.u32 %s255_s16, 4  ;;  %s258_s21 = int_to_ptr.vmem [resolvable:$true] %s257_s21  ;;  %s260_s22 = int_to_ptr.hbm [resolvable:$true] %s259_s22 }
  0x1e   : > { %184 = vperm.xlu2 %408, %v156_v3   ;;  %226 = vmatpush.msra.mxu0 %v219_v12  ;;  %s245_s23 = scalar_lea.sflag [#allocation4], %s149_s5  ;;  %s457_s24 = sshra.s32 %s260_s22, 4  ;;  %s458_s24 = int_to_ptr.hbm [resolvable:$true] %s457_s24 }
  0x1f   : > { %s459_s25 = scalar_lea.hbm %s458_s24, 8  ;;  %s463_s27 = scalar_lea.hbm %s635_s2, 16 }
  0x20   : > { %227 = vmatpush.msra.mxu0 %v218_v13  ;;  %p460_p0 = scmp.ne.s32.totalorder %s458_s24, %s459_s25  ;;  %p464_p3 = scmp.lt.s32.totalorder %s458_s24, %s635_s2 }
  0x21   : > { %p465_p4 = scmp.lt.s32.totalorder %s463_s27, %s459_s25 }
  0x22   : > { %228 = vmatpush.msra.mxu0 %v217_v14  ;;  %p461_p1 = pnand %p460_p0, %p576_p5 }
  0x23   : > { %p466_p7 = por %p465_p4, %p464_p3 }
  0x24   : > { %229 = vmatpush.msra.mxu0 %v216_v15  ;;  %p462_p2 = pneg %p461_p1 }
  0x25   : > { %405 = vset.pattern.permute.xlu0 %v517_v7  ;;  %407 = vset.pattern.permute.xlu1 %v518_v8 }
  0x26   : > { %166 = vperm.xlu0 %405, %v156_v3   ;;  %178 = vperm.xlu1 %407, %v156_v3   ;;  %p467_p8 = pnand %p466_p7, %p462_p2 }
  0x27   : > { %409 = vset.pattern.permute.xlu2 %v519_v9  ;;  %230 = vmatpush.msra.mxu0 %v215_v16 }
  0x28   : > { %190 = vperm.xlu2 %409, %v156_v3  }
  0x29   : > { %231 = vmatpush.msra.mxu0 %v214_v17 }
  0x2b   : > { %232 = vmatpush.msra.mxu0 %v213_v18 }
  0x2d   : > { %233 = vmatpush.msra.mxu0 %v212_v19 }
  0x2e   : > { %410 = vset.pattern.permute.xlu1 %v520_v10  ;;  %412 = vset.pattern.permute.xlu0 %v521_v11 }
  0x2f   : > { %196 = vperm.xlu1 %410, %v156_v3   ;;  %234 = vmatpush.msra.mxu0 %v211_v20 }
  0x30   : > { %411 = vset.pattern.permute.xlu2 %v521_v11 }
  0x31   : > { %202 = vperm.xlu2 %411, %v156_v3   ;;  %235 = vmatpush.msra.mxu0 %v210_v21 }
  0x33   : > { %236 = vmatpush.msra.mxu0 %v209_v22 }
  0x35   : > { %237 = vmatpush.msra.mxu0 %v208_v23 }
  0x37   : > { %238 = vmatpush.msra.mxu0 %v207_v24 }
  0x78   : > { %v185_v25 = vpop.permute.xlu2 %184 }
  0x79   : > { %vm186_vm4 = vcmp.eq.s32.totalorder %v185_v25, %v158_v29 }
  0x7a   : > { %v187_v42 = vsel %vm186_vm4, 1.0, %v522_v33 }
  0x82   : > { %v191_v30 = vpop.permute.xlu2 %190 }
  0x83   : > { %vm192_vm5 = vcmp.eq.s32.totalorder %v191_v30, %v158_v29 }
  0x84   : > { %v193_v45 = vsel %vm192_vm5, 1.0, %v522_v33 }
  0x8b   : > { %v203_v40 = vpop.permute.xlu2 %202 }
  0x8c   : > { %vm204_vm6 = vcmp.eq.s32.totalorder %v203_v40, %v158_v29 }
  0x8d   : > { %v205_v48 = vsel %vm204_vm6, 1.0, %v522_v33 }
  0x8f   : > { %v161_v27 = vpop.permute.xlu0 %160  ;;  %v173_v28 = vpop.permute.xlu1 %172 }
  0x90   : > { %vm162_vm0 = vcmp.eq.s32.totalorder %v161_v27, %v158_v29  ;;  %vm174_vm1 = vcmp.eq.s32.totalorder %v173_v28, %v158_v29 }
  0x91   : > { %v163_v34 = vsel %vm162_vm0, 1.0, %v522_v33  ;;  %v175_v37 = vsel %vm174_vm1, 1.0, %v522_v33 }
  0x98   : > { %v167_v31 = vpop.permute.xlu0 %166  ;;  %v179_v32 = vpop.permute.xlu1 %178 }
  0x99   : > { %vm168_vm2 = vcmp.eq.s32.totalorder %v167_v31, %v158_v29  ;;  %vm180_vm3 = vcmp.eq.s32.totalorder %v179_v32, %v158_v29 }
  0x9a   : > { %v169_v35 = vsel %vm168_vm2, 1.0, %v522_v33  ;;  %v181_v39 = vsel %vm180_vm3, 1.0, %v522_v33 }
  0x9b   : > { %v170_v36 = vadd.f32 %v169_v35, %v163_v34 }
  0x9d   : > { %v176_v38 = vadd.f32 %v175_v37, %v170_v36 }
  0x9f   : > { %v182_v41 = vadd.f32 %v181_v39, %v176_v38 }
  0xa1   : > { %v188_v43 = vadd.f32 %v187_v42, %v182_v41  ;;  %v197_v44 = vpop.permute.xlu1 %196 }
  0xa2   : > { %vm198_vm7 = vcmp.eq.s32.totalorder %v197_v44, %v158_v29 }
  0xa3   : > { %v194_v46 = vadd.f32 %v193_v45, %v188_v43  ;;  %v199_v47 = vsel %vm198_vm7, 1.0, %v522_v33 }
  0xa5   : > { %v200_v49 = vadd.f32 %v199_v47, %v194_v46 }
  0xa7   : > { %v206_v50 = vadd.f32 %v205_v48, %v200_v49 }
  0xa9   : > { %239 = vmatmul.f32.vlgmr.msra.gmra.mxu0 %v206_v50 }
 0x126   : > { %v240_v51 = vpop.f32.mrf.mxu0 }
 0x127   : > { %243 = vst [vmem:[%s151_s17] sm:$0xff] %v240_v51 }
 0x128   : > { %470 = shalt.err (!%p467_p8)
}
 0x129   : > { %347 = dma.vmem_to_hbm [thread:$0]  (%p576_p5), %s258_s21, 128, %s260_s22, %s245_s23  }
 0x12a PF: > { %p359_p9 = scmp.ge.s32.totalorder %s509_s12, 2  ;;  %s271_s30 = sand.u32 1, %s497_s9  }
 0x12b   : > { %s272_s3 = scalar_lea.sflag [#allocation4], %s271_s30 }
 0x12c   : > { %p354_p10 = pnand %p359_p9, %p580_p6 }
 0x12e   : > { %p355_p11 = pneg %p354_p10 }
 0x130   : > { %492 = dma.done.wait (%p355_p11), %s272_s3, 128  }
 0x131   : > { %494 = vsyncadd (%p355_p11), %s272_s3, 4294967168  ;;  %p13_p12 = scmp.ge.s32.totalorder %s563_s15, 4   ;;  %s638_s9 = smov %s501_s10 }
 0x132   : > { %s639_s10 = smov %s505_s11  ;;  %s640_s11 = smov %s574_s18 }
 0x133   : > { %s641_s12 = smov %s563_s15  ;;  %15 = sbr.rel (!%p13_p12) target bundleno = 4 (0x4), region = 68 }
 0x138   :  { %278 = vsyncpa [#allocation3], 1 }
 0x139   :  { %280 = vsyncpa [#allocation3 + $0x1], 1 }
 0x13a   :  { %281 = vsyncpa [#allocation4], 1 }
 0x13b   :  { %283 = vsyncpa [#allocation4 + $0x1], 1 }

</bundles_post_ra>
